<compile_context>
chip_gen: v5e
topology: v5e:2x2
jax: 0.10.0
libtpu: 0.0.40
codegen_flags: <defaults>
</compile_context>

<pallas_src>
import math
from typing import NamedTuple, Optional

import numpy as np
import jax
import jax.numpy as jnp
from jax.experimental import pallas as pl
from jax.experimental.pallas import tpu as pltpu


def _round_up(x, m):
    return ((x + m - 1) // m) * m


def _vmem_capacity_bytes():
    try:
        return int(pltpu.get_tpu_info().vmem_capacity_bytes)
    except Exception:
        return 64 * 1024 * 1024  # conservative: v7x per-TensorCore VMEM


class GNNPlan(NamedTuple):
    n: int
    in_f: int
    out_f: int
    tm: int
    tk: int
    n_pad: int
    out_f_pad: int


def plan_gnn_layer(n, in_f, out_f, *, tm=1024, tk=512):
    """Tile plan.  Both tiles are 128-aligned and one divides the other, so
    n_pad = round_up(N, max(tm, tk)) and padding stays a few rows, not O(lcm)."""
    out_f_pad = _round_up(out_f, 128)
    tm_eff = _round_up(min(tm, _round_up(n, 128)), 128)
    tk_eff = _round_up(min(tk, _round_up(n, 128)), 128)
    if tm_eff % tk_eff != 0 and tk_eff % tm_eff != 0:
        tk_eff = math.gcd(tm_eff, tk_eff)  # still a multiple of 128
    n_pad = _round_up(n, max(tm_eff, tk_eff))
    return GNNPlan(n, in_f, out_f, tm_eff, tk_eff, n_pad, out_f_pad)


def prepare_laplacian(lap, plan: GNNPlan, stream_dtype=jnp.bfloat16):
    """Cast (narrow FIRST) + zero-pad a dense Laplacian ONCE, outside the hot
    path.  Intended to be called once per graph and reused across layers."""
    sdt = np.dtype(stream_dtype)
    if lap.dtype != sdt and sdt.itemsize < np.dtype(lap.dtype).itemsize:
        lap = lap.astype(sdt)                      # cast before pad: fewer bytes
    n = lap.shape[0]
    if plan.n_pad != n:
        lap = jnp.pad(lap, ((0, plan.n_pad - n), (0, plan.n_pad - n)))
    return lap.astype(sdt)


# -----------------------------------------------------------------------------
# Prologue kernel: per-node projections, computed exactly once.
#   [P0 | P1] = F @ [W0 | W2] + (F*F) @ [W1 | W3]
# -----------------------------------------------------------------------------
def _make_project_kernel(out_f_pad):
    def kernel(f_ref, w01_ref, w23_ref, p0_ref, p1_ref):
        f = f_ref[...]
        f2 = f * f                                   # inter_feature, once per row tile
        p = (jnp.dot(f, w01_ref[...], preferred_element_type=jnp.float32)
             + jnp.dot(f2, w23_ref[...], preferred_element_type=jnp.float32))
        p0_ref[...] = p[:, :out_f_pad].astype(p0_ref.dtype)
        p1_ref[...] = p[:, out_f_pad:].astype(p1_ref.dtype)
    return kernel


# -----------------------------------------------------------------------------
# Main kernel: K-tiled graph propagation.
#   out_tile = bias_sum + sum_k ( L[i,k] @ P0[k] + L3[i,k] @ P1[k] )
# P0/P1 are either VMEM-resident (sliced in-kernel) or streamed per-k tiles.
# f32 outputs accumulate directly into the revisited output block.
# -----------------------------------------------------------------------------
def _make_propagate_kernel(tk, resident_p, direct_out):
    def kernel(l_ref, l3_ref, p0_ref, p1_ref, b_ref, o_ref, *scratch):
        acc_ref = o_ref if direct_out else scratch[0]
        k = pl.program_id(1)

        @pl.when(k == 0)
        def _init():
            # Fold the summed bias into the accumulator init (no epilogue add).
            acc_ref[...] = jnp.broadcast_to(b_ref[...], acc_ref.shape)

        if resident_p:
            off = pl.multiple_of(k * tk, tk)
            p0 = p0_ref[pl.ds(off, tk), :]
            p1 = p1_ref[pl.ds(off, tk), :]
        else:
            p0 = p0_ref[...]
            p1 = p1_ref[...]

        acc_ref[...] += jnp.dot(l_ref[...], p0, preferred_element_type=jnp.float32)
        acc_ref[...] += jnp.dot(l3_ref[...], p1, preferred_element_type=jnp.float32)

        if not direct_out:
            @pl.when(k == pl.num_programs(1) - 1)
            def _fin():
                o_ref[...] = acc_ref[...].astype(o_ref.dtype)

    return kernel


def gnn_layer_forward(laplacian, ui_laplacian, features, weights_t, biases, *,
                      tm=1024, tk=512, stream_dtype=jnp.bfloat16,
                      resident_p: Optional[bool] = None,
                      vmem_limit_bytes: Optional[int] = None):
    """NGCF GNNLayer forward.

    laplacian, ui_laplacian : (N, N) dense Laplacians, or already prepared
                              (n_pad, n_pad) arrays in stream_dtype from
                              prepare_laplacian() (preferred: cast+pad once).
    features                : (N, inF)
    weights_t               : (4, inF, outF) stacked transposed Linear weights,
                              order [linear, interActTransform, linear1, interActTransform1].
    biases                  : (4, outF) matching biases.
    stream_dtype            : dtype of the N^2 L/L3 stream and of P0/P1
                              (default bf16); MXU accumulation stays f32.
    """
    n, in_f = features.shape
    out_f = weights_t.shape[-1]
    out_dtype = features.dtype
    sdt = np.dtype(stream_dtype)
    p_dtype = sdt  # P0/P1 re-read (n_pad/tm) times -> store them in the stream dtype

    plan = plan_gnn_layer(n, in_f, out_f, tm=tm, tk=tk)
    tm_e, tk_e, n_pad, out_f_pad = plan.tm, plan.tk, plan.n_pad, plan.out_f_pad

    # ---- L / L3 prep: skipped entirely when the caller prepared them once ----
    if laplacian.shape[0] != n_pad or laplacian.dtype != sdt:
        laplacian = prepare_laplacian(laplacian, plan, sdt)
    if ui_laplacian.shape[0] != n_pad or ui_laplacian.dtype != sdt:
        ui_laplacian = prepare_laplacian(ui_laplacian, plan, sdt)

    # ---- small operands (cheap to prep per call) ------------------------------
    feats = features.astype(jnp.float32)
    if n_pad != n:
        feats = jnp.pad(feats, ((0, n_pad - n), (0, 0)))
    w = weights_t.astype(jnp.float32)
    b = biases.astype(jnp.float32)
    if out_f_pad != out_f:
        w = jnp.pad(w, ((0, 0), (0, 0), (0, out_f_pad - out_f)))
        b = jnp.pad(b, ((0, 0), (0, out_f_pad - out_f)))
    # Packed projection weights: one wide (inF, 2*outF_pad) operand per F-power.
    w01 = jnp.concatenate([w[0], w[2]], axis=1)   # multiplies F
    w23 = jnp.concatenate([w[1], w[3]], axis=1)   # multiplies F*F
    bias_sum = jnp.sum(b, axis=0, keepdims=True)  # (1, outF_pad)  (keep OUT of P0/P1)

    # ---- generation-aware VMEM budgeting --------------------------------------
    cap = _vmem_capacity_bytes()
    budget = int(cap * 0.75)
    l_bytes = sdt.itemsize
    p_bytes = p_dtype.itemsize
    out_bytes = np.dtype(out_dtype).itemsize
    base_need = (2 * 2 * tm_e * tk_e * l_bytes              # L, L3 double-buffered
                 + tm_e * out_f_pad * (4 + 2 * out_bytes)   # acc + out block
                 + 2 * out_f_pad * 4)                       # bias
    p_tiles_need = 2 * 2 * tk_e * out_f_pad * p_bytes
    p_resident_need = 2 * 2 * n_pad * out_f_pad * p_bytes   # worst-case 2 buffers
    if resident_p is None:
        resident_p = (base_need + p_resident_need) <= budget
    need = base_need + (p_resident_need if resident_p else p_tiles_need)
    if vmem_limit_bytes is None:
        vmem_limit_bytes = min(int(cap * 0.9), max(need + (4 << 20), 32 << 20))

    # ---- prologue: P0 / P1 computed exactly once -------------------------------
    p0, p1 = pl.pallas_call(
        _make_project_kernel(out_f_pad),
        out_shape=(jax.ShapeDtypeStruct((n_pad, out_f_pad), p_dtype),
                   jax.ShapeDtypeStruct((n_pad, out_f_pad), p_dtype)),
        grid_spec=pltpu.PrefetchScalarGridSpec(
            num_scalar_prefetch=0,
            grid=(n_pad // tm_e,),
            in_specs=[
                pl.BlockSpec((tm_e, in_f), lambda i: (i, 0)),
                pl.BlockSpec((in_f, 2 * out_f_pad), lambda i: (0, 0)),
                pl.BlockSpec((in_f, 2 * out_f_pad), lambda i: (0, 0)),
            ],
            out_specs=(
                pl.BlockSpec((tm_e, out_f_pad), lambda i: (i, 0)),
                pl.BlockSpec((tm_e, out_f_pad), lambda i: (i, 0)),
            ),
        ),
        compiler_params=pltpu.CompilerParams(
            dimension_semantics=("parallel",),
            vmem_limit_bytes=vmem_limit_bytes),
    )(feats, w01, w23)

    # ---- main: K-tiled propagation (HBM-bound on the 2*N^2 L/L3 stream) --------
    direct_out = np.dtype(out_dtype) == np.dtype(np.float32)
    if resident_p:
        p_specs = [pl.BlockSpec((n_pad, out_f_pad), lambda i, k: (0, 0)),
                   pl.BlockSpec((n_pad, out_f_pad), lambda i, k: (0, 0))]
    else:
        p_specs = [pl.BlockSpec((tk_e, out_f_pad), lambda i, k: (k, 0)),
                   pl.BlockSpec((tk_e, out_f_pad), lambda i, k: (k, 0))]

    out = pl.pallas_call(
        _make_propagate_kernel(tk_e, resident_p, direct_out),
        out_shape=jax.ShapeDtypeStruct((n_pad, out_f_pad), out_dtype),
        grid_spec=pltpu.PrefetchScalarGridSpec(
            num_scalar_prefetch=0,
            grid=(n_pad // tm_e, n_pad // tk_e),
            in_specs=[
                pl.BlockSpec((tm_e, tk_e), lambda i, k: (i, k)),    # L  tile
                pl.BlockSpec((tm_e, tk_e), lambda i, k: (i, k)),    # L3 tile
                *p_specs,                                           # P0, P1
                pl.BlockSpec((1, out_f_pad), lambda i, k: (0, 0)),  # summed bias
            ],
            out_specs=pl.BlockSpec((tm_e, out_f_pad), lambda i, k: (i, 0)),
            scratch_shapes=([] if direct_out
                            else [pltpu.VMEM((tm_e, out_f_pad), jnp.float32)]),
        ),
        compiler_params=pltpu.CompilerParams(
            dimension_semantics=("parallel", "arbitrary"),
            vmem_limit_bytes=vmem_limit_bytes),
    )(laplacian, ui_laplacian, p0, p1, bias_sum)

    return out[:n, :out_f]


def reference_forward(laplacian, ui_laplacian, features, weights_t, biases):
    f = features.astype(jnp.float32)
    f2 = f * f
    l = laplacian.astype(jnp.float32)
    l3 = ui_laplacian.astype(jnp.float32)
    w = weights_t.astype(jnp.float32)
    b = biases.astype(jnp.float32)
    return (l @ f @ w[0] + l @ f2 @ w[1]
            + l3 @ f @ w[2] + l3 @ f2 @ w[3]
            + jnp.sum(b, axis=0))


if __name__ == "__main__":
    # Small, deterministic synthetic problem (N nodes, inF -> outF embedding).
    N, inF, outF = 256, 64, 64
    key = jax.random.PRNGKey(0)
    k_l, k_l3, k_f, k_w, k_b = jax.random.split(key, 5)

    laplacian = jax.random.normal(k_l, (N, N), dtype=jnp.float32) * 0.1
    ui_laplacian = jax.random.normal(k_l3, (N, N), dtype=jnp.float32) * 0.1
    features = jax.random.normal(k_f, (N, inF), dtype=jnp.float32)

    # PyTorch-Linear-style init: U(-1/sqrt(inF), 1/sqrt(inF)).
    bound = 1.0 / (inF ** 0.5)
    weights_t = jax.random.uniform(k_w, (4, inF, outF), dtype=jnp.float32,
                                   minval=-bound, maxval=bound)
    biases = jax.random.uniform(k_b, (4, outF), dtype=jnp.float32,
                                minval=-bound, maxval=bound)

    ref = reference_forward(laplacian, ui_laplacian, features, weights_t, biases)
    ref_scale = jnp.max(jnp.abs(ref))

    # 1) exact f32 path, small tiles + streamed P0/P1 (exercises K-accumulation).
    out_a = gnn_layer_forward(laplacian, ui_laplacian, features, weights_t, biases,
                              tm=128, tk=128, stream_dtype=jnp.float32,
                              resident_p=False)
    out_a = jax.block_until_ready(out_a)
    assert out_a.shape == (N, outF)
    assert jnp.allclose(out_a, ref, atol=1e-4, rtol=1e-4)

    # 2) exact f32 path, production tile defaults (VMEM-resident P0/P1 here).
    out_b = jax.block_until_ready(
        gnn_layer_forward(laplacian, ui_laplacian, features, weights_t, biases,
                          stream_dtype=jnp.float32))
    assert jnp.allclose(out_b, ref, atol=1e-4, rtol=1e-4)

    # 3) default bf16-streaming path; L/L3 cast+padded ONCE outside the call
    #    (quantization error expected -- looser, normalized tolerance).
    plan = plan_gnn_layer(N, inF, outF)
    lap_bf16 = prepare_laplacian(laplacian, plan)
    ui_bf16 = prepare_laplacian(ui_laplacian, plan)
    out_c = jax.block_until_ready(
        gnn_layer_forward(lap_bf16, ui_bf16, features, weights_t, biases))
    err_c = jnp.max(jnp.abs(out_c - ref)) / ref_scale
    assert out_c.shape == (N, outF)
    assert bool(err_c < 5e-2), f"bf16 streaming error too large: {err_c}"

    # 4) narrow output dtype path (f32 VMEM accumulator + epilogue cast).
    out_d = jax.block_until_ready(
        gnn_layer_forward(lap_bf16, ui_bf16, features.astype(jnp.bfloat16),
                          weights_t, biases))
    err_d = jnp.max(jnp.abs(out_d.astype(jnp.float32) - ref)) / ref_scale
    assert out_d.dtype == jnp.bfloat16 and out_d.shape == (N, outF)
    assert bool(err_d < 1e-1), f"bf16-output error too large: {err_d}"

    print("KERNEL_OK")
</pallas_src>

<mosaic_0001>
module attributes {stable_mosaic.version = 11 : i64} {
  func.func @kernel(%arg0: i32, %arg1: memref<128x64xf32, #tpu.memory_space<vmem>>, %arg2: memref<64x256xf32, #tpu.memory_space<vmem>>, %arg3: memref<64x256xf32, #tpu.memory_space<vmem>>, %arg4: memref<128x128xf32, #tpu.memory_space<vmem>>, %arg5: memref<128x128xf32, #tpu.memory_space<vmem>>) attributes {dimension_semantics = [#tpu.dimension_semantics<parallel>], iteration_bounds = array<i64: 2>, scalar_prefetch = 0 : i64, scratch_operands = 0 : i64, tpu.core_type = #tpu.core_type<tc>, window_params = [{transform_indices = @transform_0, window_bounds = array<i64: 128, 64>}, {pipeline_mode = #tpu.pipeline_mode<synchronous>, transform_indices = @transform_1, window_bounds = array<i64: 64, 256>}, {pipeline_mode = #tpu.pipeline_mode<synchronous>, transform_indices = @transform_2, window_bounds = array<i64: 64, 256>}, {transform_indices = @transform_3, window_bounds = array<i64: 128, 128>}, {transform_indices = @transform_4, window_bounds = array<i64: 128, 128>}]} {
    %c0 = arith.constant 0 : index
    %c0_0 = arith.constant 0 : index
    %0 = vector.load %arg1[%c0, %c0_0] : memref<128x64xf32, #tpu.memory_space<vmem>>, vector<128x64xf32>
    %1 = arith.mulf %0, %0 : vector<128x64xf32>
    %c0_1 = arith.constant 0 : index
    %c0_2 = arith.constant 0 : index
    %2 = vector.load %arg2[%c0_1, %c0_2] : memref<64x256xf32, #tpu.memory_space<vmem>>, vector<64x256xf32>
    %cst = arith.constant dense<0.000000e+00> : vector<128x256xf32>
    %3 = tpu.matmul %0, %2, %cst {dimension_numbers = #tpu.dot_dimension_numbers<[1], [0], [0], [1], [0, 0, 1, 1], [], []>} : vector<128x64xf32>, vector<64x256xf32>, vector<128x256xf32> -> vector<128x256xf32>
    %c0_3 = arith.constant 0 : index
    %c0_4 = arith.constant 0 : index
    %4 = vector.load %arg3[%c0_3, %c0_4] : memref<64x256xf32, #tpu.memory_space<vmem>>, vector<64x256xf32>
    %cst_5 = arith.constant dense<0.000000e+00> : vector<128x256xf32>
    %5 = tpu.matmul %1, %4, %cst_5 {dimension_numbers = #tpu.dot_dimension_numbers<[1], [0], [0], [1], [0, 0, 1, 1], [], []>} : vector<128x64xf32>, vector<64x256xf32>, vector<128x256xf32> -> vector<128x256xf32>
    %6 = arith.addf %3, %5 : vector<128x256xf32>
    %7 = vector.extract_strided_slice %6 {offsets = [0, 0], sizes = [128, 128], strides = [1, 1]} : vector<128x256xf32> to vector<128x128xf32>
    %c0_6 = arith.constant 0 : index
    %c0_7 = arith.constant 0 : index
    %8 = vector.load %arg4[%c0_6, %c0_7] : memref<128x128xf32, #tpu.memory_space<vmem>>, vector<128x128xf32>
    tpu.vector_store %arg4[%c0_6, %c0_7], %7 {strides = array<i32>} : memref<128x128xf32, #tpu.memory_space<vmem>>, vector<128x128xf32>,
    %9 = vector.extract_strided_slice %6 {offsets = [0, 128], sizes = [128, 128], strides = [1, 1]} : vector<128x256xf32> to vector<128x128xf32>
    %c0_8 = arith.constant 0 : index
    %c0_9 = arith.constant 0 : index
    %10 = vector.load %arg5[%c0_8, %c0_9] : memref<128x128xf32, #tpu.memory_space<vmem>>, vector<128x128xf32>
    tpu.vector_store %arg5[%c0_8, %c0_9], %9 {strides = array<i32>} : memref<128x128xf32, #tpu.memory_space<vmem>>, vector<128x128xf32>,
    return
  }
  func.func @transform_0(%arg0: i32) -> (i32, i32) {
    %c0_i32 = arith.constant 0 : i32
    %c0_i32_0 = arith.constant 0 : i32
    return %arg0, %c0_i32 : i32, i32
  }
  func.func @transform_1(%arg0: i32) -> (i32, i32) {
    %c0_i32 = arith.constant 0 : i32
    %c0_i32_0 = arith.constant 0 : i32
    %c0_i32_1 = arith.constant 0 : i32
    return %c0_i32, %c0_i32_0 : i32, i32
  }
  func.func @transform_2(%arg0: i32) -> (i32, i32) {
    %c0_i32 = arith.constant 0 : i32
    %c0_i32_0 = arith.constant 0 : i32
    %c0_i32_1 = arith.constant 0 : i32
    return %c0_i32, %c0_i32_0 : i32, i32
  }
  func.func @transform_3(%arg0: i32) -> (i32, i32) {
    %c0_i32 = arith.constant 0 : i32
    %c0_i32_0 = arith.constant 0 : i32
    return %arg0, %c0_i32 : i32, i32
  }
  func.func @transform_4(%arg0: i32) -> (i32, i32) {
    %c0_i32 = arith.constant 0 : i32
    %c0_i32_0 = arith.constant 0 : i32
    return %arg0, %c0_i32 : i32, i32
  }
}

</mosaic_0001>

<bundles_post_ra>
// kernel: tpu_custom_call.1
= control target key start
LH: loop header
LB: loop body
LE: loop exit
PB: predicated region body
PF: predicated region fallthrough
CT: control target
= control target key end

     0   :  { %10 = vsyncpa [#allocation3], 0  ;;  %s1376_s0 = inlined_call_operand.vmem [shape: f32[256,64], index: 0, kind: input, shape index: {}]   ;;  %s1377_s1 = inlined_call_operand.vmem [shape: f32[64,256], index: 1, kind: input, shape index: {}]   ;;  %s1378_s2 = inlined_call_operand.vmem [shape: f32[64,256], index: 2, kind: input, shape index: {}]   ;;  %s1379_s3 = inlined_call_operand.hbm [shape: f32[256,128], index: 3, kind: output, shape index: {0}]   ;;  %s1380_s4 = inlined_call_operand.hbm [shape: f32[256,128], index: 4, kind: output, shape index: {1}]  }
   0x1   :  { %12 = vsyncpa [#allocation3 + $0x1], 0 }
   0x2   :  { %13 = vsyncpa [#allocation5], 0 }
   0x3   :  { %15 = vsyncpa [#allocation5 + $0x1], 0  ;;  %s1048_s15 = smov 0   ;;  %s1050_s16 = smov 0  }
   0x4   :  { %s1052_s17 = smov 0   ;;  %s1054_s18 = smov 0  }
   0x5 LB: > { %s1069_s19 = sadd.s32 4294967295, %s1019_s18   ;;  %s797_s20 = sadd.s32 4294967294, %s1019_s18   ;;  %s1019_s18 = sphi %s1054_s18, %s1386_s18   ;;  %s1015_s17 = sphi %s1052_s17, %s1385_s17   ;;  %s1011_s16 = sphi %s1050_s16, %s1384_s16   ;;  %s1007_s15 = sphi %s1048_s15, %s1383_s15  }
   0x6   : > { %s1073_s21 = sadd.s32 1, %s1019_s18   ;;  %s96_s22 = sadd.s32 1, %s1015_s17 }
   0x7   : > { %s93_s23 = ssub.s32 %s1019_s18, %s1073_s21  ;;  %p106_p0 = scmp.ne.s32.totalorder %s1015_s17, %s1011_s16 }
   0x8   : > { %p94_p1 = scmp.eq.s32.totalorder %s93_s23, 0  ;;  %p107_p2 = scmp.eq.s32.totalorder %s1069_s19, 1 }
   0x9   : > { %p112_p3 = scmp.ne.s32.totalorder %s1011_s16, %s1007_s15  ;;  %p113_p4 = scmp.eq.s32.totalorder %s797_s20, 1 }
   0xa   : > { %s1084_s24 = scalar_select %p94_p1, %s1015_s17, %s96_s22  }
   0xb   : > { %p1086_p5 = por %p107_p2, %p106_p0  ;;  %p1090_p6 = por %p113_p4, %p112_p3 }
   0xc   : > { %p800_p7 = scmp.ge.s32.totalorder %s1019_s18, 1  ;;  %p172_p8 = scmp.lt.s32.totalorder %s1019_s18, 3 }
   0xe   : > { %p173_p9 = pnand %p800_p7, %p172_p8 }
   0xf   : > { %s803_s7 = sshll.u32 (!%p173_p9), %s1069_s19, 4  ;;  %s1282_s30 = sand.u32 (!%p173_p9), 1, %s1011_s16  }
  0x10   : > { %176 = sbr.rel (%p173_p9) target bundleno = 308 (0x134), region = 32  ;;  %p204_p10 = scmp.lt.s32.totalorder (!%p173_p9), %s803_s7, 31 }
  0x11   : > { %s801_s6 = sshll.u32 (!%p173_p9), %s1282_s30, 7  ;;  %s877_s9 = sshll.u32 (!%p173_p9), %s1069_s19, 7 }
  0x12   : > { %s1288_s8 = scalar_lea.vmem (!%p173_p9), [#allocation4], %s801_s6  ;;  %s681_s12 = scalar_lea.hbm (!%p173_p9), %s1379_s3, %s877_s9 }
  0x13   : > { %s698_s14 = scalar_lea.hbm (!%p173_p9), %s1380_s4, %s877_s9  ;;  %s684_s20 = sshll.u32 (!%p173_p9), %s681_s12, 4  ;;  %s685_s20 = int_to_ptr.hbm [resolvable:$true] %s684_s20 }
  0x14   : > { %s699_s19 = sshll.u32 (!%p173_p9), %s1288_s8, 4  ;;  %s701_s22 = sshll.u32 (!%p173_p9), %s698_s14, 4  ;;  %s1329_s19 = int_to_ptr.vmem [resolvable:$true] %s699_s19  ;;  %s1331_s22 = int_to_ptr.hbm [resolvable:$true] %s701_s22 }
  0x15   : > { %v257_v0 = vld [vmem:[%s1377_s1 + $0x70] sm:$0xff]  ;;  %v258_v1 = vld [vmem:[%s1377_s1 + $0x78] sm:$0xff]  ;;  %v255_v2 = vld [vmem:[%s1377_s1 + $0x60] sm:$0xff]  ;;  %s1388_s7 = smov (!%p204_p10, %s803_s7), 31  ;;  %vm275_vm0 = vcmask 523264   ;;  %s665_s23 = scalar_lea.sflag [#allocation3], %s1282_s30 }
  0x16   : > { %510 = vmatpush.msra.mxu2 %v257_v0  ;;  %575 = vmatpush.msra.mxu3 %v258_v1  ;;  %v256_v3 = vld [vmem:[%s1377_s1 + $0x68] sm:$0xff]  ;;  %v253_v4 = vld [vmem:[%s1377_s1 + $0x50] sm:$0xff]  ;;  %v254_v5 = vld [vmem:[%s1377_s1 + $0x58] sm:$0xff]  ;;  %s804_s5 = sshll.u32 %s1388_s7, 3  ;;  %s939_s27 = sshra.s32 %s685_s20, 4  ;;  %s940_s27 = int_to_ptr.hbm [resolvable:$true] %s939_s27 }
  0x17   : > { %v273_v6 = vld [vmem:[%s1378_s2 + $0x70] sm:$0xff]  ;;  %v274_v7 = vld [vmem:[%s1378_s2 + $0x78] sm:$0xff]  ;;  %v271_v8 = vld [vmem:[%s1378_s2 + $0x60] sm:$0xff]  ;;  %s1175_s29 = scalar_lea.vmem %s1376_s0, %s804_s5  ;;  %s941_s28 = scalar_lea.hbm %s940_s27, 128 }
  0x18   : > { %511 = vmatpush.msra.mxu2 %v255_v2  ;;  %576 = vmatpush.msra.mxu3 %v256_v3  ;;  %v272_v9 = vld [vmem:[%s1378_s2 + $0x68] sm:$0xff]  ;;  %v251_v10 = vld [vmem:[%s1377_s1 + $0x40] sm:$0xff]  ;;  %v269_v12 = vld [vmem:[%s1378_s2 + $0x50] sm:$0xff]  ;;  %p942_p11 = scmp.ne.s32.totalorder %s940_s27, %s941_s28  ;;  %s945_s10 = scalar_lea.hbm %s1379_s3, 256 }
  0x19   : > { %332 = vmatpush.msra.mxu0 %v273_v6  ;;  %397 = vmatpush.msra.mxu1 %v274_v7  ;;  %v252_v11 = vld [vmem:[%s1377_s1 + $0x48] sm:$0xff]  ;;  %v270_v13 = vld [vmem:[%s1378_s2 + $0x58] sm:$0xff]  ;;  %v249_v14 = vld [vmem:[%s1377_s1 + $0x30] sm:$0xff]  ;;  %p946_p0 = scmp.lt.s32.totalorder %s940_s27, %s1379_s3  ;;  %p947_p1 = scmp.lt.s32.totalorder %s945_s10, %s941_s28 }
  0x1a   : > { %512 = vmatpush.msra.mxu2 %v253_v4  ;;  %577 = vmatpush.msra.mxu3 %v254_v5  ;;  %v250_v15 = vld [vmem:[%s1377_s1 + $0x38] sm:$0xff]  ;;  %v267_v16 = vld [vmem:[%s1378_s2 + $0x40] sm:$0xff]  ;;  %v268_v17 = vld [vmem:[%s1378_s2 + $0x48] sm:$0xff]  ;;  %p943_p12 = pnand %p942_p11, %p1086_p5 }
  0x1b   : > { %333 = vmatpush.msra.mxu0 %v271_v8  ;;  %398 = vmatpush.msra.mxu1 %v272_v9  ;;  %v247_v18 = vld [vmem:[%s1377_s1 + $0x20] sm:$0xff]  ;;  %v248_v19 = vld [vmem:[%s1377_s1 + $0x28] sm:$0xff]  ;;  %v265_v20 = vld [vmem:[%s1378_s2 + $0x30] sm:$0xff]  ;;  %p948_p2 = por %p947_p1, %p946_p0 }
  0x1c   : > { %513 = vmatpush.msra.mxu2 %v251_v10  ;;  %578 = vmatpush.msra.mxu3 %v252_v11  ;;  %v266_v21 = vld [vmem:[%s1378_s2 + $0x38] sm:$0xff]  ;;  %v245_v22 = vld [vmem:[%s1377_s1 + $0x10] sm:$0xff]  ;;  %v263_v24 = vld [vmem:[%s1378_s2 + $0x20] sm:$0xff]  ;;  %p944_p13 = pneg %p943_p12 }
  0x1d   : > { %334 = vmatpush.msra.mxu0 %v269_v12  ;;  %399 = vmatpush.msra.mxu1 %v270_v13  ;;  %v246_v23 = vld [vmem:[%s1377_s1 + $0x18] sm:$0xff]  ;;  %v264_v25 = vld [vmem:[%s1378_s2 + $0x28] sm:$0xff]  ;;  %v243_v26 = vld [vmem:[%s1377_s1] sm:$0xff] }
  0x1e   : > { %514 = vmatpush.msra.mxu2 %v249_v14  ;;  %579 = vmatpush.msra.mxu3 %v250_v15  ;;  %v244_v27 = vld [vmem:[%s1377_s1 + $0x8] sm:$0xff]  ;;  %v211_v28 = vld [vmem:[%s1175_s29] sm:$0xff]  ;;  %v261_v29 = vld [vmem:[%s1378_s2 + $0x10] sm:$0xff]  ;;  %p949_p3 = pnand %p948_p2, %p944_p13 }
  0x1f   : > { %335 = vmatpush.msra.mxu0 %v267_v16  ;;  %400 = vmatpush.msra.mxu1 %v268_v17  ;;  %v262_v30 = vld [vmem:[%s1378_s2 + $0x18] sm:$0xff]  ;;  %v259_v31 = vld [vmem:[%s1378_s2] sm:$0xff]  ;;  %v260_v32 = vld [vmem:[%s1378_s2 + $0x8] sm:$0xff]  ;;  %v227_v33 = vmul.f32 %v211_v28, %v211_v28 }
  0x20   : > { %515 = vmatpush.msra.mxu2 %v247_v18  ;;  %580 = vmatpush.msra.mxu3 %v248_v19  ;;  %v212_v34 = vld [vmem:[%s1175_s29 + $0x8] sm:$0xff]  ;;  %v213_v36 = vld [vmem:[%s1175_s29 + $0x10] sm:$0xff]  ;;  %v214_v38 = vld [vmem:[%s1175_s29 + $0x18] sm:$0xff] }
  0x21   : > { %336 = vmatpush.msra.mxu0 %v265_v20  ;;  %401 = vmatpush.msra.mxu1 %v266_v21  ;;  %v228_v35 = vmul.f32 %v212_v34, %v212_v34  ;;  %v229_v37 = vmul.f32 %v213_v36, %v213_v36  ;;  %v230_v39 = vmul.f32 %v214_v38, %v214_v38  ;;  %v215_v40 = vld [vmem:[%s1175_s29 + $0x20] sm:$0xff]  ;;  %v216_v42 = vld [vmem:[%s1175_s29 + $0x28] sm:$0xff]  ;;  %v217_v44 = vld [vmem:[%s1175_s29 + $0x30] sm:$0xff] }
  0x22   : > { %516 = vmatpush.msra.mxu2 %v245_v22  ;;  %581 = vmatpush.msra.mxu3 %v246_v23  ;;  %v231_v41 = vmul.f32 %v215_v40, %v215_v40  ;;  %v232_v43 = vmul.f32 %v216_v42, %v216_v42  ;;  %v233_v45 = vmul.f32 %v217_v44, %v217_v44  ;;  %v218_v46 = vld [vmem:[%s1175_s29 + $0x38] sm:$0xff]  ;;  %v219_v48 = vld [vmem:[%s1175_s29 + $0x40] sm:$0xff]  ;;  %v220_v50 = vld [vmem:[%s1175_s29 + $0x48] sm:$0xff] }
  0x23   : > { %337 = vmatpush.msra.mxu0 %v263_v24  ;;  %402 = vmatpush.msra.mxu1 %v264_v25  ;;  %v234_v47 = vmul.f32 %v218_v46, %v218_v46  ;;  %v235_v49 = vmul.f32 %v219_v48, %v219_v48  ;;  %v236_v51 = vmul.f32 %v220_v50, %v220_v50  ;;  %v221_v52 = vld [vmem:[%s1175_s29 + $0x50] sm:$0xff]  ;;  %v222_v54 = vld [vmem:[%s1175_s29 + $0x58] sm:$0xff]  ;;  %v223_v56 = vld [vmem:[%s1175_s29 + $0x60] sm:$0xff] }
  0x24   : > { %517 = vmatpush.msra.mxu2 %v243_v26  ;;  %582 = vmatpush.msra.mxu3 %v244_v27  ;;  %v237_v53 = vmul.f32 %v221_v52, %v221_v52  ;;  %v238_v55 = vmul.f32 %v222_v54, %v222_v54  ;;  %v239_v57 = vmul.f32 %v223_v56, %v223_v56  ;;  %v224_v58 = vld [vmem:[%s1175_s29 + $0x68] sm:$0xff]  ;;  %v225_v60 = vld [vmem:[%s1175_s29 + $0x70] sm:$0xff]  ;;  %v226_v62 = vld [vmem:[%s1175_s29 + $0x78] sm:$0xff]  ;;  %s1285_s29 = scalar_lea.vmem [#allocation2], %s801_s6 }
  0x25   : > { %837 = vmatmul.msk.f32.vlgmr.msra.gmra.mxu2 %vm275_vm0, %v211_v28  ;;  %853 = vmatmul.msk.f32.vlgmr.msra.gmra.mxu3 %vm275_vm0, %v211_v28  ;;  %v240_v59 = vmul.f32 %v224_v58, %v224_v58  ;;  %v241_v61 = vmul.f32 %v225_v60, %v225_v60  ;;  %v242_v63 = vmul.f32 %v226_v62, %v226_v62  ;;  %s682_s7 = sshll.u32 %s1285_s29, 4  ;;  %s683_s7 = int_to_ptr.vmem [resolvable:$true] %s682_s7 }
  0x26   : > { %338 = vmatpush.msra.mxu0 %v261_v29  ;;  %403 = vmatpush.msra.mxu1 %v262_v30 }
  0x28   : > { %339 = vmatpush.msra.mxu0 %v259_v31  ;;  %404 = vmatpush.msra.mxu1 %v260_v32 }
  0x29   : > { %805 = vmatmul.msk.f32.vlgmr.msra.gmra.mxu0 %vm275_vm0, %v227_v33  ;;  %821 = vmatmul.msk.f32.vlgmr.msra.gmra.mxu1 %vm275_vm0, %v227_v33 }
  0x2d   : > { %838 = vmatmul.msk.f32.gmra.mxu2 %vm275_vm0, %v212_v34  ;;  %854 = vmatmul.msk.f32.gmra.mxu3 %vm275_vm0, %v212_v34 }
  0x31   : > { %806 = vmatmul.msk.f32.gmra.mxu0 %vm275_vm0, %v228_v35  ;;  %822 = vmatmul.msk.f32.gmra.mxu1 %vm275_vm0, %v228_v35 }
  0x35   : > { %839 = vmatmul.msk.f32.gmra.mxu2 %vm275_vm0, %v213_v36  ;;  %855 = vmatmul.msk.f32.gmra.mxu3 %vm275_vm0, %v213_v36 }
  0x39   : > { %807 = vmatmul.msk.f32.gmra.mxu0 %vm275_vm0, %v229_v37  ;;  %823 = vmatmul.msk.f32.gmra.mxu1 %vm275_vm0, %v229_v37 }
  0x3d   : > { %840 = vmatmul.msk.f32.gmra.mxu2 %vm275_vm0, %v214_v38  ;;  %856 = vmatmul.msk.f32.gmra.mxu3 %vm275_vm0, %v214_v38 }
  0x41   : > { %808 = vmatmul.msk.f32.gmra.mxu0 %vm275_vm0, %v230_v39  ;;  %824 = vmatmul.msk.f32.gmra.mxu1 %vm275_vm0, %v230_v39 }
  0x45   : > { %841 = vmatmul.msk.f32.gmra.mxu2 %vm275_vm0, %v215_v40  ;;  %857 = vmatmul.msk.f32.gmra.mxu3 %vm275_vm0, %v215_v40 }
  0x49   : > { %809 = vmatmul.msk.f32.gmra.mxu0 %vm275_vm0, %v231_v41  ;;  %825 = vmatmul.msk.f32.gmra.mxu1 %vm275_vm0, %v231_v41 }
  0x4d   : > { %842 = vmatmul.msk.f32.gmra.mxu2 %vm275_vm0, %v216_v42  ;;  %858 = vmatmul.msk.f32.gmra.mxu3 %vm275_vm0, %v216_v42 }
  0x51   : > { %810 = vmatmul.msk.f32.gmra.mxu0 %vm275_vm0, %v232_v43  ;;  %826 = vmatmul.msk.f32.gmra.mxu1 %vm275_vm0, %v232_v43 }
  0x55   : > { %843 = vmatmul.msk.f32.gmra.mxu2 %vm275_vm0, %v217_v44  ;;  %859 = vmatmul.msk.f32.gmra.mxu3 %vm275_vm0, %v217_v44 }
  0x59   : > { %811 = vmatmul.msk.f32.gmra.mxu0 %vm275_vm0, %v233_v45  ;;  %827 = vmatmul.msk.f32.gmra.mxu1 %vm275_vm0, %v233_v45 }
  0x5d   : > { %844 = vmatmul.msk.f32.gmra.mxu2 %vm275_vm0, %v218_v46  ;;  %860 = vmatmul.msk.f32.gmra.mxu3 %vm275_vm0, %v218_v46 }
  0x61   : > { %812 = vmatmul.msk.f32.gmra.mxu0 %vm275_vm0, %v234_v47  ;;  %828 = vmatmul.msk.f32.gmra.mxu1 %vm275_vm0, %v234_v47 }
  0x65   : > { %845 = vmatmul.msk.f32.gmra.mxu2 %vm275_vm0, %v219_v48  ;;  %861 = vmatmul.msk.f32.gmra.mxu3 %vm275_vm0, %v219_v48 }
  0x69   : > { %813 = vmatmul.msk.f32.gmra.mxu0 %vm275_vm0, %v235_v49  ;;  %829 = vmatmul.msk.f32.gmra.mxu1 %vm275_vm0, %v235_v49 }
  0x6d   : > { %846 = vmatmul.msk.f32.gmra.mxu2 %vm275_vm0, %v220_v50  ;;  %862 = vmatmul.msk.f32.gmra.mxu3 %vm275_vm0, %v220_v50 }
  0x71   : > { %814 = vmatmul.msk.f32.gmra.mxu0 %vm275_vm0, %v236_v51  ;;  %830 = vmatmul.msk.f32.gmra.mxu1 %vm275_vm0, %v236_v51 }
  0x75   : > { %847 = vmatmul.msk.f32.gmra.mxu2 %vm275_vm0, %v221_v52  ;;  %863 = vmatmul.msk.f32.gmra.mxu3 %vm275_vm0, %v221_v52 }
  0x79   : > { %815 = vmatmul.msk.f32.gmra.mxu0 %vm275_vm0, %v237_v53  ;;  %831 = vmatmul.msk.f32.gmra.mxu1 %vm275_vm0, %v237_v53 }
  0x7d   : > { %848 = vmatmul.msk.f32.gmra.mxu2 %vm275_vm0, %v222_v54  ;;  %864 = vmatmul.msk.f32.gmra.mxu3 %vm275_vm0, %v222_v54 }
  0x81   : > { %816 = vmatmul.msk.f32.gmra.mxu0 %vm275_vm0, %v238_v55  ;;  %832 = vmatmul.msk.f32.gmra.mxu1 %vm275_vm0, %v238_v55 }
  0x85   : > { %849 = vmatmul.msk.f32.gmra.mxu2 %vm275_vm0, %v223_v56  ;;  %865 = vmatmul.msk.f32.gmra.mxu3 %vm275_vm0, %v223_v56 }
  0x89   : > { %817 = vmatmul.msk.f32.gmra.mxu0 %vm275_vm0, %v239_v57  ;;  %833 = vmatmul.msk.f32.gmra.mxu1 %vm275_vm0, %v239_v57 }
  0x8d   : > { %850 = vmatmul.msk.f32.gmra.mxu2 %vm275_vm0, %v224_v58  ;;  %866 = vmatmul.msk.f32.gmra.mxu3 %vm275_vm0, %v224_v58 }
  0x91   : > { %818 = vmatmul.msk.f32.gmra.mxu0 %vm275_vm0, %v240_v59  ;;  %834 = vmatmul.msk.f32.gmra.mxu1 %vm275_vm0, %v240_v59 }
  0x95   : > { %851 = vmatmul.msk.f32.gmra.mxu2 %vm275_vm0, %v225_v60  ;;  %867 = vmatmul.msk.f32.gmra.mxu3 %vm275_vm0, %v225_v60 }
  0x99   : > { %819 = vmatmul.msk.f32.gmra.mxu0 %vm275_vm0, %v241_v61  ;;  %835 = vmatmul.msk.f32.gmra.mxu1 %vm275_vm0, %v241_v61 }
  0x9d   : > { %852 = vmatmul.msk.f32.gmra.mxu2 %vm275_vm0, %v226_v62  ;;  %868 = vmatmul.msk.f32.gmra.mxu3 %vm275_vm0, %v226_v62 }
  0xa1   : > { %820 = vmatmul.msk.f32.gmra.mxu0 %vm275_vm0, %v242_v63  ;;  %836 = vmatmul.msk.f32.gmra.mxu1 %vm275_vm0, %v242_v63 }
  0xa6   : > { %v341_v0 = vpop.f32.mrf.mxu0  ;;  %v406_v1 = vpop.f32.mrf.mxu1 }
  0xa8   : > { %v519_v2 = vpop.f32.mrf.mxu2  ;;  %v584_v3 = vpop.f32.mrf.mxu3 }
  0xa9   : > { %v520_v4 = vadd.f32 %v519_v2, %v341_v0  ;;  %v585_v5 = vadd.f32 %v584_v3, %v406_v1 }
  0xab   : > { %632 = vst [vmem:[%s1285_s29] sm:$0xff] %v520_v4 }
  0xac   : > { %648 = vst [vmem:[%s1288_s8] sm:$0xff] %v585_v5 }
  0xae   : > { %v344_v6 = vpop.f32.mrf.mxu0  ;;  %v409_v7 = vpop.f32.mrf.mxu1 }
  0xb0   : > { %v522_v8 = vpop.f32.mrf.mxu2  ;;  %v587_v9 = vpop.f32.mrf.mxu3 }
  0xb1   : > { %v523_v10 = vadd.f32 %v522_v8, %v344_v6  ;;  %v588_v11 = vadd.f32 %v587_v9, %v409_v7 }
  0xb3   : > { %633 = vst [vmem:[%s1285_s29 + $0x8] sm:$0xff] %v523_v10 }
  0xb4   : > { %649 = vst [vmem:[%s1288_s8 + $0x8] sm:$0xff] %v588_v11 }
  0xb6   : > { %v347_v12 = vpop.f32.mrf.mxu0  ;;  %v412_v13 = vpop.f32.mrf.mxu1 }
  0xb8   : > { %v525_v14 = vpop.f32.mrf.mxu2  ;;  %v590_v15 = vpop.f32.mrf.mxu3 }
  0xb9   : > { %v526_v16 = vadd.f32 %v525_v14, %v347_v12  ;;  %v591_v17 = vadd.f32 %v590_v15, %v412_v13 }
  0xbb   : > { %634 = vst [vmem:[%s1285_s29 + $0x10] sm:$0xff] %v526_v16 }
  0xbc   : > { %650 = vst [vmem:[%s1288_s8 + $0x10] sm:$0xff] %v591_v17 }
  0xbe   : > { %v350_v18 = vpop.f32.mrf.mxu0  ;;  %v415_v19 = vpop.f32.mrf.mxu1 }
  0xc0   : > { %v528_v20 = vpop.f32.mrf.mxu2  ;;  %v593_v21 = vpop.f32.mrf.mxu3 }
  0xc1   : > { %v529_v22 = vadd.f32 %v528_v20, %v350_v18  ;;  %v594_v23 = vadd.f32 %v593_v21, %v415_v19 }
  0xc3   : > { %635 = vst [vmem:[%s1285_s29 + $0x18] sm:$0xff] %v529_v22 }
  0xc4   : > { %651 = vst [vmem:[%s1288_s8 + $0x18] sm:$0xff] %v594_v23 }
  0xc6   : > { %v353_v24 = vpop.f32.mrf.mxu0  ;;  %v418_v25 = vpop.f32.mrf.mxu1 }
  0xc8   : > { %v531_v26 = vpop.f32.mrf.mxu2  ;;  %v596_v27 = vpop.f32.mrf.mxu3 }
  0xc9   : > { %v532_v28 = vadd.f32 %v531_v26, %v353_v24  ;;  %v597_v29 = vadd.f32 %v596_v27, %v418_v25 }
  0xcb   : > { %636 = vst [vmem:[%s1285_s29 + $0x20] sm:$0xff] %v532_v28 }
  0xcc   : > { %652 = vst [vmem:[%s1288_s8 + $0x20] sm:$0xff] %v597_v29 }
  0xce   : > { %v356_v30 = vpop.f32.mrf.mxu0  ;;  %v421_v31 = vpop.f32.mrf.mxu1 }
  0xd0   : > { %v534_v32 = vpop.f32.mrf.mxu2  ;;  %v599_v33 = vpop.f32.mrf.mxu3 }
  0xd1   : > { %v535_v34 = vadd.f32 %v534_v32, %v356_v30  ;;  %v600_v35 = vadd.f32 %v599_v33, %v421_v31 }
  0xd3   : > { %637 = vst [vmem:[%s1285_s29 + $0x28] sm:$0xff] %v535_v34 }
  0xd4   : > { %653 = vst [vmem:[%s1288_s8 + $0x28] sm:$0xff] %v600_v35 }
  0xd6   : > { %v359_v36 = vpop.f32.mrf.mxu0  ;;  %v424_v37 = vpop.f32.mrf.mxu1 }
  0xd8   : > { %v537_v38 = vpop.f32.mrf.mxu2  ;;  %v602_v39 = vpop.f32.mrf.mxu3 }
  0xd9   : > { %v538_v40 = vadd.f32 %v537_v38, %v359_v36  ;;  %v603_v41 = vadd.f32 %v602_v39, %v424_v37 }
  0xdb   : > { %638 = vst [vmem:[%s1285_s29 + $0x30] sm:$0xff] %v538_v40 }
  0xdc   : > { %654 = vst [vmem:[%s1288_s8 + $0x30] sm:$0xff] %v603_v41 }
  0xde   : > { %v362_v42 = vpop.f32.mrf.mxu0  ;;  %v427_v43 = vpop.f32.mrf.mxu1 }
  0xe0   : > { %v540_v44 = vpop.f32.mrf.mxu2  ;;  %v605_v45 = vpop.f32.mrf.mxu3 }
  0xe1   : > { %v541_v46 = vadd.f32 %v540_v44, %v362_v42  ;;  %v606_v47 = vadd.f32 %v605_v45, %v427_v43 }
  0xe3   : > { %639 = vst [vmem:[%s1285_s29 + $0x38] sm:$0xff] %v541_v46 }
  0xe4   : > { %655 = vst [vmem:[%s1288_s8 + $0x38] sm:$0xff] %v606_v47 }
  0xe6   : > { %v365_v48 = vpop.f32.mrf.mxu0  ;;  %v430_v49 = vpop.f32.mrf.mxu1 }
  0xe8   : > { %v543_v50 = vpop.f32.mrf.mxu2  ;;  %v608_v51 = vpop.f32.mrf.mxu3 }
  0xe9   : > { %v544_v52 = vadd.f32 %v543_v50, %v365_v48  ;;  %v609_v53 = vadd.f32 %v608_v51, %v430_v49 }
  0xeb   : > { %640 = vst [vmem:[%s1285_s29 + $0x40] sm:$0xff] %v544_v52 }
  0xec   : > { %656 = vst [vmem:[%s1288_s8 + $0x40] sm:$0xff] %v609_v53 }
  0xee   : > { %v368_v54 = vpop.f32.mrf.mxu0  ;;  %v433_v55 = vpop.f32.mrf.mxu1 }
  0xf0   : > { %v546_v56 = vpop.f32.mrf.mxu2  ;;  %v611_v57 = vpop.f32.mrf.mxu3 }
  0xf1   : > { %v547_v58 = vadd.f32 %v546_v56, %v368_v54  ;;  %v612_v59 = vadd.f32 %v611_v57, %v433_v55 }
  0xf3   : > { %641 = vst [vmem:[%s1285_s29 + $0x48] sm:$0xff] %v547_v58 }
  0xf4   : > { %657 = vst [vmem:[%s1288_s8 + $0x48] sm:$0xff] %v612_v59 }
  0xf6   : > { %v371_v60 = vpop.f32.mrf.mxu0  ;;  %v436_v61 = vpop.f32.mrf.mxu1 }
  0xf8   : > { %v549_v62 = vpop.f32.mrf.mxu2  ;;  %v614_v63 = vpop.f32.mrf.mxu3 }
  0xf9   : > { %v550_v0 = vadd.f32 %v549_v62, %v371_v60  ;;  %v615_v1 = vadd.f32 %v614_v63, %v436_v61 }
  0xfb   : > { %642 = vst [vmem:[%s1285_s29 + $0x50] sm:$0xff] %v550_v0 }
  0xfc   : > { %658 = vst [vmem:[%s1288_s8 + $0x50] sm:$0xff] %v615_v1 }
  0xfe   : > { %v374_v2 = vpop.f32.mrf.mxu0  ;;  %v439_v3 = vpop.f32.mrf.mxu1 }
 0x100   : > { %v552_v4 = vpop.f32.mrf.mxu2  ;;  %v617_v5 = vpop.f32.mrf.mxu3 }
 0x101   : > { %v553_v6 = vadd.f32 %v552_v4, %v374_v2  ;;  %v618_v7 = vadd.f32 %v617_v5, %v439_v3 }
 0x103   : > { %643 = vst [vmem:[%s1285_s29 + $0x58] sm:$0xff] %v553_v6 }
 0x104   : > { %659 = vst [vmem:[%s1288_s8 + $0x58] sm:$0xff] %v618_v7 }
 0x106   : > { %v377_v8 = vpop.f32.mrf.mxu0  ;;  %v442_v9 = vpop.f32.mrf.mxu1 }
 0x108   : > { %v555_v10 = vpop.f32.mrf.mxu2  ;;  %v620_v11 = vpop.f32.mrf.mxu3 }
 0x109   : > { %v556_v12 = vadd.f32 %v555_v10, %v377_v8  ;;  %v621_v13 = vadd.f32 %v620_v11, %v442_v9 }
 0x10b   : > { %644 = vst [vmem:[%s1285_s29 + $0x60] sm:$0xff] %v556_v12 }
 0x10c   : > { %660 = vst [vmem:[%s1288_s8 + $0x60] sm:$0xff] %v621_v13 }
 0x10e   : > { %v380_v14 = vpop.f32.mrf.mxu0  ;;  %v445_v15 = vpop.f32.mrf.mxu1 }
 0x110   : > { %v558_v16 = vpop.f32.mrf.mxu2  ;;  %v623_v17 = vpop.f32.mrf.mxu3 }
 0x111   : > { %v559_v18 = vadd.f32 %v558_v16, %v380_v14  ;;  %v624_v19 = vadd.f32 %v623_v17, %v445_v15 }
 0x113   : > { %645 = vst [vmem:[%s1285_s29 + $0x68] sm:$0xff] %v559_v18 }
 0x114   : > { %661 = vst [vmem:[%s1288_s8 + $0x68] sm:$0xff] %v624_v19 }
 0x116   : > { %v383_v20 = vpop.f32.mrf.mxu0  ;;  %v448_v21 = vpop.f32.mrf.mxu1 }
 0x118   : > { %v561_v22 = vpop.f32.mrf.mxu2  ;;  %v626_v23 = vpop.f32.mrf.mxu3 }
 0x119   : > { %v562_v24 = vadd.f32 %v561_v22, %v383_v20  ;;  %v627_v25 = vadd.f32 %v626_v23, %v448_v21 }
 0x11b   : > { %646 = vst [vmem:[%s1285_s29 + $0x70] sm:$0xff] %v562_v24 }
 0x11c   : > { %662 = vst [vmem:[%s1288_s8 + $0x70] sm:$0xff] %v627_v25 }
 0x11e   : > { %v386_v26 = vpop.f32.mrf.mxu0  ;;  %v451_v27 = vpop.f32.mrf.mxu1 }
 0x120   : > { %v564_v28 = vpop.f32.mrf.mxu2  ;;  %v629_v29 = vpop.f32.mrf.mxu3 }
 0x121   : > { %v565_v30 = vadd.f32 %v564_v28, %v386_v26  ;;  %v630_v31 = vadd.f32 %v629_v29, %v451_v27 }
 0x123   : > { %647 = vst [vmem:[%s1285_s29 + $0x78] sm:$0xff] %v565_v30 }
 0x124   : > { %663 = vst [vmem:[%s1288_s8 + $0x78] sm:$0xff] %v630_v31 }
 0x125   : > { %952 = shalt.err (!%p949_p3)
}
 0x126   : > { %s1021_s29 = smov 128   ;;  %s1022_s8 = smov 8  }
 0x127   : > { %879 = dma.vmem_to_hbm [thread:$0]  (%p1086_p5), %s683_s7, 2048, %s685_s20, %s665_s23, %s1021_s29, %s1021_s29, %s1022_s8  }
 0x128   : > { %s670_s5 = scalar_lea.sflag [#allocation5], %s1282_s30  ;;  %s967_s13 = sshra.s32 %s1331_s22, 4  ;;  %s968_s13 = int_to_ptr.hbm [resolvable:$true] %s967_s13 }
 0x129   : > { %s969_s14 = scalar_lea.hbm %s968_s13, 128  ;;  %s973_s6 = scalar_lea.hbm %s1380_s4, 256 }
 0x12a   : > { %p970_p4 = scmp.ne.s32.totalorder %s968_s13, %s969_s14  ;;  %p974_p9 = scmp.lt.s32.totalorder %s968_s13, %s1380_s4 }
 0x12b   : > { %p975_p10 = scmp.lt.s32.totalorder %s973_s6, %s969_s14 }
 0x12c   : > { %p971_p7 = pnand %p970_p4, %p1086_p5 }
 0x12d   : > { %p976_p11 = por %p975_p10, %p974_p9 }
 0x12e   : > { %p972_p8 = pneg %p971_p7 }
 0x130   : > { %p977_p12 = pnand %p976_p11, %p972_p8 }
 0x132   : > { %980 = shalt.err (!%p977_p12)
}
 0x133   : > { %880 = dma.vmem_to_hbm [thread:$0]  (%p1086_p5), %s1329_s19, 2048, %s1331_s22, %s670_s5, %s1021_s29, %s1021_s29, %s1022_s8  }
 0x134 PF: > { %p890_p13 = scmp.ge.s32.totalorder %s1019_s18, 2  ;;  %s716_s30 = sand.u32 1, %s1007_s15  }
 0x135   : > { %s717_s7 = scalar_lea.sflag [#allocation3], %s716_s30 }
 0x136   : > { %p884_p0 = pnand %p890_p13, %p1090_p6 }
 0x138   : > { %p885_p1 = pneg %p884_p0 }
 0x13a   : > { %998 = dma.done.wait (%p885_p1), %s717_s7, 2048  }
 0x13b   : > { %1000 = vsyncadd (%p885_p1), %s717_s7, 4294965248  ;;  %s727_s20 = scalar_lea.sflag [#allocation5], %s716_s30 }
 0x13c   : > { %1002 = dma.done.wait (%p885_p1), %s727_s20, 2048  }
 0x13d   : > { %1004 = vsyncadd (%p885_p1), %s727_s20, 4294965248  ;;  %p18_p5 = scmp.ge.s32.totalorder %s1073_s21, 4   ;;  %s1383_s15 = smov %s1011_s16 }
 0x13e   : > { %s1384_s16 = smov %s1015_s17  ;;  %s1385_s17 = smov %s1084_s24 }
 0x13f   : > { %s1386_s18 = smov %s1073_s21  ;;  %20 = sbr.rel (!%p18_p5) target bundleno = 5 (0x5), region = 84 }
 0x144   :  { %733 = vsyncpa [#allocation3], 1 }
 0x145   :  { %735 = vsyncpa [#allocation3 + $0x1], 1 }
 0x146   :  { %736 = vsyncpa [#allocation5], 1 }
 0x147   :  { %738 = vsyncpa [#allocation5 + $0x1], 1 }

</bundles_post_ra>
